<compile_context>
chip_gen: v5e
topology: v5e:2x2
jax: 0.10.0
libtpu: 0.0.40
codegen_flags: <defaults>
</compile_context>

<pallas_src>
import math

import jax
import jax.numpy as jnp
from jax.experimental import pallas as pl
from jax.experimental.pallas import tpu as pltpu

STATE_DIM = 16
HIDDEN_DIM = 32          # torch default is 256; small synthetic size here
POLICY_DIM = HIDDEN_DIM // 2
ACTION_DIM = 4
ACTION_PAD = 8           # sublane-padded output rows (8-row aligned store)
NUM_HEADS = 4
HEAD_DIM = HIDDEN_DIM // NUM_HEADS
LN_EPS = 1e-5            # torch.nn.LayerNorm default eps

# Row offsets inside the packed weight slabs (torch (out, in) layout rows).
R16_W1 = 0                            # (HIDDEN, STATE)
R16_W4 = HIDDEN_DIM                   # (ACTION_PAD, POLICY_DIM)
SLAB16_ROWS = HIDDEN_DIM + ACTION_PAD

R32_W2 = 0                            # (HIDDEN, HIDDEN)
R32_WVO = HIDDEN_DIM                  # (HIDDEN, HIDDEN)  fused v->o with LN affine folded
R32_W3 = 2 * HIDDEN_DIM               # (POLICY_DIM, HIDDEN)
SLAB32_ROWS = 2 * HIDDEN_DIM + POLICY_DIM

# Column indices inside the vector slab (each column is a feature-major
# bias / LayerNorm parameter of length HIDDEN_DIM, zero-padded at the bottom).
(C_B1, C_G1, C_BE1, C_B2, C_G2, C_BE2,
 C_BVO, C_B3, C_G3, C_BE3, C_B4) = range(11)
N_VEC = 11


def _round_up(n, m):
    return ((n + m - 1) // m) * m


def actor_kernel(x_ref, w16_ref, w32_ref, vs_ref, out_ref):
    cdt = w32_ref.dtype                           # MXU operand dtype (bf16 or f32)
    vs = vs_ref[...]                              # (HIDDEN, N_VEC) f32

    def vcol(c, rows=HIDDEN_DIM):
        return vs[:rows, c:c + 1]                 # (rows, 1) column, broadcasts over lanes

    def dense(w, h, b):
        # (out, in) @ (in, TB) -> (out, TB); f32 accumulate on the MXU.
        return jnp.dot(w, h.astype(cdt), preferred_element_type=jnp.float32) + b

    def layernorm(h, gamma=None, beta=None):
        # Reduce over the feature (sublane) axis; reuse the centered tensor.
        mu = jnp.mean(h, axis=0, keepdims=True)
        c = h - mu
        var = jnp.mean(c * c, axis=0, keepdims=True)     # biased, like torch
        n = c * jax.lax.rsqrt(var + LN_EPS)
        if gamma is not None:
            n = n * gamma + beta
        return n

    x = x_ref[...]                                       # (STATE_DIM, TB)

    # feature_net: Linear -> LayerNorm -> ReLU -> Linear -> LayerNorm -> ReLU
    h = dense(w16_ref[R16_W1:R16_W1 + HIDDEN_DIM, :], x, vcol(C_B1))
    h = jnp.maximum(layernorm(h, vcol(C_G1), vcol(C_BE1)), 0.0)
    h = dense(w32_ref[R32_W2:R32_W2 + HIDDEN_DIM, :], h, vcol(C_B2))
    h = jnp.maximum(layernorm(h, vcol(C_G2), vcol(C_BE2)), 0.0)

    # MultiHeadAttention with seq_len == 1: softmax over one key == 1, so the
    # output equals the v-projection (q/k dead); the v->o chain and the LN
    # affine (gn, bn) are pre-fused into (wvo, bvo) at pack time.
    attended = dense(w32_ref[R32_WVO:R32_WVO + HIDDEN_DIM, :], layernorm(h), vcol(C_BVO))

    # policy_net: Linear -> LayerNorm -> ReLU -> Linear -> Tanh
    p = dense(w32_ref[R32_W3:R32_W3 + POLICY_DIM, :], attended, vcol(C_B3, POLICY_DIM))
    p = jnp.maximum(layernorm(p, vcol(C_G3, POLICY_DIM), vcol(C_BE3, POLICY_DIM)), 0.0)
    p = dense(w16_ref[R16_W4:R16_W4 + ACTION_PAD, :], p, vcol(C_B4, ACTION_PAD))
    out_ref[...] = jnp.tanh(p)                    # (ACTION_PAD, TB); padded rows -> tanh(0)=0


def pack_params(params):
    """Pack torch-style params ((out,in) weights, 1-D biases) into 3 arrays."""
    (w1, b1, g1, be1, w2, b2, g2, be2, gn, bn,
     wq, bq, wk, bk, wv, bv, wo, bo, w3, b3, g3, be3, w4, b4) = params
    del wq, bq, wk, bk                            # dead: softmax over a single key == 1

    f32 = jnp.float32
    # Fuse v->o and fold the attention LayerNorm affine, all in f32.
    wvo = wo.astype(f32) @ wv.astype(f32)                          # (H, H)
    bvo = wvo @ bn.astype(f32) + wo.astype(f32) @ bv.astype(f32) + bo.astype(f32)
    wvo = wvo * gn.astype(f32)[None, :]                            # fold gamma into columns

    w4p = jnp.pad(w4.astype(f32), ((0, ACTION_PAD - ACTION_DIM), (0, 0)))   # (8, POLICY)
    slab16 = jnp.concatenate([w1.astype(f32), w4p], axis=0)        # (40, 16)
    slab32 = jnp.concatenate([w2.astype(f32), wvo, w3.astype(f32)], axis=0)  # (80, 32)

    def col(v):                                                    # 1-D -> (HIDDEN, 1) column
        v = v.reshape(-1).astype(f32)
        return jnp.pad(v, (0, HIDDEN_DIM - v.shape[0]))[:, None]

    vec_slab = jnp.concatenate(
        [col(b1), col(g1), col(be1), col(b2), col(g2), col(be2),
         col(bvo), col(b3), col(g3), col(be3), col(b4)], axis=1)   # (HIDDEN, N_VEC)
    return slab16, slab32, vec_slab


def actor_forward(state, packed, *, tile_b=1024, compute_dtype=jnp.bfloat16):
    slab16, slab32, vec_slab = packed
    B = state.shape[0]

    # Batch lives on the 128-lane axis -> tiles are multiples of 128.
    Bp0 = _round_up(B, 128)
    cap = max(128, _round_up(min(tile_b, Bp0), 128))
    steps = pl.cdiv(Bp0, cap)
    if Bp0 >= 256:
        steps = max(steps, 2)          # v7x megacore: keep both TensorCores busy
    TB = _round_up(pl.cdiv(Bp0, steps), 128)
    Bp = _round_up(Bp0, TB)

    xT = state.astype(compute_dtype).T                             # (STATE_DIM, B)
    if Bp != B:
        xT = jnp.pad(xT, ((0, 0), (0, Bp - B)))

    # MXU operands in compute_dtype; bias/LN columns stay f32 (VPU math in f32).
    w16 = slab16.astype(compute_dtype)
    w32 = slab32.astype(compute_dtype)

    def wspec(a):
        return pl.BlockSpec(a.shape, lambda i: (0, 0))             # VMEM-resident weights

    out = pl.pallas_call(
        actor_kernel,
        out_shape=jax.ShapeDtypeStruct((ACTION_PAD, Bp), jnp.float32),
        grid=(Bp // TB,),
        in_specs=[
            pl.BlockSpec((STATE_DIM, TB), lambda i: (0, i)),
            wspec(w16),
            wspec(w32),
            wspec(vec_slab),
        ],
        out_specs=pl.BlockSpec((ACTION_PAD, TB), lambda i: (0, i)),
        compiler_params=pltpu.CompilerParams(dimension_semantics=("parallel",)),
    )(xT, w16, w32, vec_slab)
    return out[:ACTION_DIM, :B].T


# --------------------- deterministic parameter init (synthetic) --------------------- #
def _orthogonal(key, out_dim, in_dim, gain):
    """Mimics nn.init.orthogonal_ semantics (not torch's RNG). Returns (out, in)."""
    big, small = max(out_dim, in_dim), min(out_dim, in_dim)
    a = jax.random.normal(key, (big, small), dtype=jnp.float32)
    q, r = jnp.linalg.qr(a)
    q = q * jnp.sign(jnp.diagonal(r))
    if out_dim < in_dim:
        q = q.T
    return (gain * q).astype(jnp.float32)


def init_params(key):
    gain = math.sqrt(2.0)
    keys = jax.random.split(key, 8)

    def lin(k, in_d, out_d):
        w = _orthogonal(k, out_d, in_d, gain)               # torch layout (out, in)
        return w, jnp.zeros((out_d,), jnp.float32)

    def ln(d):
        return jnp.ones((d,), jnp.float32), jnp.zeros((d,), jnp.float32)

    w1, b1 = lin(keys[0], STATE_DIM, HIDDEN_DIM);  g1, be1 = ln(HIDDEN_DIM)
    w2, b2 = lin(keys[1], HIDDEN_DIM, HIDDEN_DIM); g2, be2 = ln(HIDDEN_DIM)
    gn, bn = ln(HIDDEN_DIM)
    wq, bq = lin(keys[2], HIDDEN_DIM, HIDDEN_DIM)
    wk, bk = lin(keys[3], HIDDEN_DIM, HIDDEN_DIM)
    wv, bv = lin(keys[4], HIDDEN_DIM, HIDDEN_DIM)
    wo, bo = lin(keys[5], HIDDEN_DIM, HIDDEN_DIM)
    w3, b3 = lin(keys[6], HIDDEN_DIM, POLICY_DIM); g3, be3 = ln(POLICY_DIM)
    w4, b4 = lin(keys[7], POLICY_DIM, ACTION_DIM)
    return [w1, b1, g1, be1, w2, b2, g2, be2, gn, bn,
            wq, bq, wk, bk, wv, bv, wo, bo, w3, b3, g3, be3, w4, b4]


# --------------------- pure-JAX reference (full attention math) --------------------- #
def actor_reference(state, params):
    (w1, b1, g1, be1, w2, b2, g2, be2, gn, bn,
     wq, bq, wk, bk, wv, bv, wo, bo, w3, b3, g3, be3, w4, b4) = params

    def lnorm(h, g, b):
        mu = h.mean(-1, keepdims=True)
        var = ((h - mu) ** 2).mean(-1, keepdims=True)
        return (h - mu) / jnp.sqrt(var + LN_EPS) * g + b

    h = jnp.maximum(lnorm(state @ w1.T + b1, g1, be1), 0.0)
    h = jnp.maximum(lnorm(h @ w2.T + b2, g2, be2), 0.0)
    B = h.shape[0]
    x = h[:, None, :]                                   # (B, 1, dim)
    xn = lnorm(x, gn, bn)
    q = (xn @ wq.T + bq).reshape(B, 1, NUM_HEADS, HEAD_DIM).transpose(0, 2, 1, 3)
    k = (xn @ wk.T + bk).reshape(B, 1, NUM_HEADS, HEAD_DIM).transpose(0, 2, 1, 3)
    v = (xn @ wv.T + bv).reshape(B, 1, NUM_HEADS, HEAD_DIM).transpose(0, 2, 1, 3)
    attn = jax.nn.softmax((q @ k.transpose(0, 1, 3, 2)) * (HEAD_DIM ** -0.5), axis=-1)
    o = (attn @ v).transpose(0, 2, 1, 3).reshape(B, 1, HIDDEN_DIM)
    attended = (o @ wo.T + bo)[:, 0, :]
    p = jnp.maximum(lnorm(attended @ w3.T + b3, g3, be3), 0.0)
    return jnp.tanh(p @ w4.T + b4)


if __name__ == "__main__":
    key = jax.random.PRNGKey(0)
    pkey, xkey1, xkey2 = jax.random.split(key, 3)
    params = init_params(pkey)
    packed = pack_params(params)

    # Small batch, f32 MXU operands (single grid step, batch padded to 128 lanes).
    state = jax.random.normal(xkey1, (2, STATE_DIM), dtype=jnp.float32)
    out = actor_forward(state, packed, compute_dtype=jnp.float32)
    jax.block_until_ready(out)
    ref = actor_reference(state, params)
    assert out.shape == (2, ACTION_DIM)
    assert jnp.allclose(out, ref, atol=2e-3, rtol=2e-3), "f32 mismatch vs reference"

    # Larger batch: multi-step (megacore-splittable) grid with lane padding.
    state2 = jax.random.normal(xkey2, (300, STATE_DIM), dtype=jnp.float32)
    out2 = actor_forward(state2, packed, compute_dtype=jnp.float32)
    jax.block_until_ready(out2)
    ref2 = actor_reference(state2, params)
    assert out2.shape == (300, ACTION_DIM)
    assert jnp.allclose(out2, ref2, atol=2e-3, rtol=2e-3), "grid f32 mismatch vs reference"

    # Default bf16 MXU-operand path (v6e/v7x friendly); LN/tanh stay in f32.
    out_bf16 = actor_forward(state2, packed)
    jax.block_until_ready(out_bf16)
    assert out_bf16.shape == (300, ACTION_DIM)
    assert jnp.max(jnp.abs(out_bf16 - ref2)) < 0.1, "bf16 mismatch vs reference"

    print("KERNEL_OK")
</pallas_src>

<mosaic_0001>
module attributes {stable_mosaic.version = 11 : i64} {
  func.func @actor_kernel(%arg0: i32, %arg1: memref<16x128xf32, #tpu.memory_space<vmem>>, %arg2: memref<40x16xf32, #tpu.memory_space<vmem>>, %arg3: memref<80x32xf32, #tpu.memory_space<vmem>>, %arg4: memref<32x11xf32, #tpu.memory_space<vmem>>, %arg5: memref<8x128xf32, #tpu.memory_space<vmem>>) attributes {dimension_semantics = [#tpu.dimension_semantics<parallel>], iteration_bounds = array<i64: 1>, scalar_prefetch = 0 : i64, scratch_operands = 0 : i64, tpu.core_type = #tpu.core_type<tc>, window_params = [{transform_indices = @transform_0, window_bounds = array<i64: 16, 128>}, {pipeline_mode = #tpu.pipeline_mode<synchronous>, transform_indices = @transform_1, window_bounds = array<i64: 40, 16>}, {pipeline_mode = #tpu.pipeline_mode<synchronous>, transform_indices = @transform_2, window_bounds = array<i64: 80, 32>}, {pipeline_mode = #tpu.pipeline_mode<synchronous>, transform_indices = @transform_3, window_bounds = array<i64: 32, 11>}, {transform_indices = @transform_4, window_bounds = array<i64: 8, 128>}]} {
    %c0 = arith.constant 0 : index
    %c0_0 = arith.constant 0 : index
    %0 = vector.load %arg4[%c0, %c0_0] : memref<32x11xf32, #tpu.memory_space<vmem>>, vector<32x11xf32>
    %c0_1 = arith.constant 0 : index
    %c0_2 = arith.constant 0 : index
    %1 = vector.load %arg1[%c0_1, %c0_2] : memref<16x128xf32, #tpu.memory_space<vmem>>, vector<16x128xf32>
    %c0_3 = arith.constant 0 : index
    %c0_4 = arith.constant 0 : index
    %2 = vector.load %arg2[%c0_3, %c0_4] : memref<40x16xf32, #tpu.memory_space<vmem>>, vector<32x16xf32>
    %3 = vector.extract_strided_slice %0 {offsets = [0, 0], sizes = [32, 1], strides = [1, 1]} : vector<32x11xf32> to vector<32x1xf32>
    %cst = arith.constant dense<0.000000e+00> : vector<32x128xf32>
    %4 = tpu.matmul %2, %1, %cst {dimension_numbers = #tpu.dot_dimension_numbers<[1], [0], [0], [1], [0, 0, 1, 1], [], []>} : vector<32x16xf32>, vector<16x128xf32>, vector<32x128xf32> -> vector<32x128xf32>
    %5 = vector.broadcast %3 : vector<32x1xf32> to vector<32x128xf32>
    %6 = arith.addf %4, %5 : vector<32x128xf32>
    %7 = vector.extract_strided_slice %0 {offsets = [0, 1], sizes = [32, 1], strides = [1, 1]} : vector<32x11xf32> to vector<32x1xf32>
    %8 = vector.extract_strided_slice %0 {offsets = [0, 2], sizes = [32, 1], strides = [1, 1]} : vector<32x11xf32> to vector<32x1xf32>
    %cst_5 = arith.constant dense<0.000000e+00> : vector<128xf32>
    %9 = vector.multi_reduction <add>, %6, %cst_5 [0] : vector<32x128xf32> to vector<128xf32>
    %10 = vector.shape_cast %9 : vector<128xf32> to vector<1x128xf32>
    %cst_6 = arith.constant 3.200000e+01 : f32
    %11 = vector.broadcast %cst_6 : f32 to vector<1x128xf32>
    %12 = arith.divf %10, %11 : vector<1x128xf32>
    %13 = vector.broadcast %12 : vector<1x128xf32> to vector<32x128xf32>
    %14 = arith.subf %6, %13 : vector<32x128xf32>
    %15 = arith.mulf %14, %14 : vector<32x128xf32>
    %cst_7 = arith.constant dense<0.000000e+00> : vector<128xf32>
    %16 = vector.multi_reduction <add>, %15, %cst_7 [0] : vector<32x128xf32> to vector<128xf32>
    %17 = vector.shape_cast %16 : vector<128xf32> to vector<1x128xf32>
    %cst_8 = arith.constant 3.200000e+01 : f32
    %18 = vector.broadcast %cst_8 : f32 to vector<1x128xf32>
    %19 = arith.divf %17, %18 : vector<1x128xf32>
    %cst_9 = arith.constant 9.99999974E-6 : f32
    %20 = vector.broadcast %cst_9 : f32 to vector<1x128xf32>
    %21 = arith.addf %19, %20 : vector<1x128xf32>
    %22 = math.rsqrt %21 : vector<1x128xf32>
    %23 = vector.broadcast %22 : vector<1x128xf32> to vector<32x128xf32>
    %24 = arith.mulf %14, %23 : vector<32x128xf32>
    %25 = vector.broadcast %7 : vector<32x1xf32> to vector<32x128xf32>
    %26 = arith.mulf %24, %25 : vector<32x128xf32>
    %27 = vector.broadcast %8 : vector<32x1xf32> to vector<32x128xf32>
    %28 = arith.addf %26, %27 : vector<32x128xf32>
    %cst_10 = arith.constant 0.000000e+00 : f32
    %29 = vector.broadcast %cst_10 : f32 to vector<32x128xf32>
    %30 = arith.maximumf %28, %29 : vector<32x128xf32>
    %c0_11 = arith.constant 0 : index
    %c0_12 = arith.constant 0 : index
    %31 = vector.load %arg3[%c0_11, %c0_12] : memref<80x32xf32, #tpu.memory_space<vmem>>, vector<32x32xf32>
    %32 = vector.extract_strided_slice %0 {offsets = [0, 3], sizes = [32, 1], strides = [1, 1]} : vector<32x11xf32> to vector<32x1xf32>
    %cst_13 = arith.constant dense<0.000000e+00> : vector<32x128xf32>
    %33 = tpu.matmul %31, %30, %cst_13 {dimension_numbers = #tpu.dot_dimension_numbers<[1], [0], [0], [1], [0, 0, 1, 1], [], []>} : vector<32x32xf32>, vector<32x128xf32>, vector<32x128xf32> -> vector<32x128xf32>
    %34 = vector.broadcast %32 : vector<32x1xf32> to vector<32x128xf32>
    %35 = arith.addf %33, %34 : vector<32x128xf32>
    %36 = vector.extract_strided_slice %0 {offsets = [0, 4], sizes = [32, 1], strides = [1, 1]} : vector<32x11xf32> to vector<32x1xf32>
    %37 = vector.extract_strided_slice %0 {offsets = [0, 5], sizes = [32, 1], strides = [1, 1]} : vector<32x11xf32> to vector<32x1xf32>
    %cst_14 = arith.constant dense<0.000000e+00> : vector<128xf32>
    %38 = vector.multi_reduction <add>, %35, %cst_14 [0] : vector<32x128xf32> to vector<128xf32>
    %39 = vector.shape_cast %38 : vector<128xf32> to vector<1x128xf32>
    %cst_15 = arith.constant 3.200000e+01 : f32
    %40 = vector.broadcast %cst_15 : f32 to vector<1x128xf32>
    %41 = arith.divf %39, %40 : vector<1x128xf32>
    %42 = vector.broadcast %41 : vector<1x128xf32> to vector<32x128xf32>
    %43 = arith.subf %35, %42 : vector<32x128xf32>
    %44 = arith.mulf %43, %43 : vector<32x128xf32>
    %cst_16 = arith.constant dense<0.000000e+00> : vector<128xf32>
    %45 = vector.multi_reduction <add>, %44, %cst_16 [0] : vector<32x128xf32> to vector<128xf32>
    %46 = vector.shape_cast %45 : vector<128xf32> to vector<1x128xf32>
    %cst_17 = arith.constant 3.200000e+01 : f32
    %47 = vector.broadcast %cst_17 : f32 to vector<1x128xf32>
    %48 = arith.divf %46, %47 : vector<1x128xf32>
    %cst_18 = arith.constant 9.99999974E-6 : f32
    %49 = vector.broadcast %cst_18 : f32 to vector<1x128xf32>
    %50 = arith.addf %48, %49 : vector<1x128xf32>
    %51 = math.rsqrt %50 : vector<1x128xf32>
    %52 = vector.broadcast %51 : vector<1x128xf32> to vector<32x128xf32>
    %53 = arith.mulf %43, %52 : vector<32x128xf32>
    %54 = vector.broadcast %36 : vector<32x1xf32> to vector<32x128xf32>
    %55 = arith.mulf %53, %54 : vector<32x128xf32>
    %56 = vector.broadcast %37 : vector<32x1xf32> to vector<32x128xf32>
    %57 = arith.addf %55, %56 : vector<32x128xf32>
    %cst_19 = arith.constant 0.000000e+00 : f32
    %58 = vector.broadcast %cst_19 : f32 to vector<32x128xf32>
    %59 = arith.maximumf %57, %58 : vector<32x128xf32>
    %c32 = arith.constant 32 : index
    %c0_20 = arith.constant 0 : index
    %60 = vector.load %arg3[%c32, %c0_20] : memref<80x32xf32, #tpu.memory_space<vmem>>, vector<32x32xf32>
    %cst_21 = arith.constant dense<0.000000e+00> : vector<128xf32>
    %61 = vector.multi_reduction <add>, %59, %cst_21 [0] : vector<32x128xf32> to vector<128xf32>
    %62 = vector.shape_cast %61 : vector<128xf32> to vector<1x128xf32>
    %cst_22 = arith.constant 3.200000e+01 : f32
    %63 = vector.broadcast %cst_22 : f32 to vector<1x128xf32>
    %64 = arith.divf %62, %63 : vector<1x128xf32>
    %65 = vector.broadcast %64 : vector<1x128xf32> to vector<32x128xf32>
    %66 = arith.subf %59, %65 : vector<32x128xf32>
    %67 = arith.mulf %66, %66 : vector<32x128xf32>
    %cst_23 = arith.constant dense<0.000000e+00> : vector<128xf32>
    %68 = vector.multi_reduction <add>, %67, %cst_23 [0] : vector<32x128xf32> to vector<128xf32>
    %69 = vector.shape_cast %68 : vector<128xf32> to vector<1x128xf32>
    %cst_24 = arith.constant 3.200000e+01 : f32
    %70 = vector.broadcast %cst_24 : f32 to vector<1x128xf32>
    %71 = arith.divf %69, %70 : vector<1x128xf32>
    %cst_25 = arith.constant 9.99999974E-6 : f32
    %72 = vector.broadcast %cst_25 : f32 to vector<1x128xf32>
    %73 = arith.addf %71, %72 : vector<1x128xf32>
    %74 = math.rsqrt %73 : vector<1x128xf32>
    %75 = vector.broadcast %74 : vector<1x128xf32> to vector<32x128xf32>
    %76 = arith.mulf %66, %75 : vector<32x128xf32>
    %77 = vector.extract_strided_slice %0 {offsets = [0, 6], sizes = [32, 1], strides = [1, 1]} : vector<32x11xf32> to vector<32x1xf32>
    %cst_26 = arith.constant dense<0.000000e+00> : vector<32x128xf32>
    %78 = tpu.matmul %60, %76, %cst_26 {dimension_numbers = #tpu.dot_dimension_numbers<[1], [0], [0], [1], [0, 0, 1, 1], [], []>} : vector<32x32xf32>, vector<32x128xf32>, vector<32x128xf32> -> vector<32x128xf32>
    %79 = vector.broadcast %77 : vector<32x1xf32> to vector<32x128xf32>
    %80 = arith.addf %78, %79 : vector<32x128xf32>
    %c64 = arith.constant 64 : index
    %c0_27 = arith.constant 0 : index
    %81 = vector.load %arg3[%c64, %c0_27] : memref<80x32xf32, #tpu.memory_space<vmem>>, vector<16x32xf32>
    %82 = vector.extract_strided_slice %0 {offsets = [0, 7], sizes = [16, 1], strides = [1, 1]} : vector<32x11xf32> to vector<16x1xf32>
    %cst_28 = arith.constant dense<0.000000e+00> : vector<16x128xf32>
    %83 = tpu.matmul %81, %80, %cst_28 {dimension_numbers = #tpu.dot_dimension_numbers<[1], [0], [0], [1], [0, 0, 1, 1], [], []>} : vector<16x32xf32>, vector<32x128xf32>, vector<16x128xf32> -> vector<16x128xf32>
    %84 = vector.broadcast %82 : vector<16x1xf32> to vector<16x128xf32>
    %85 = arith.addf %83, %84 : vector<16x128xf32>
    %86 = vector.extract_strided_slice %0 {offsets = [0, 8], sizes = [16, 1], strides = [1, 1]} : vector<32x11xf32> to vector<16x1xf32>
    %87 = vector.extract_strided_slice %0 {offsets = [0, 9], sizes = [16, 1], strides = [1, 1]} : vector<32x11xf32> to vector<16x1xf32>
    %cst_29 = arith.constant dense<0.000000e+00> : vector<128xf32>
    %88 = vector.multi_reduction <add>, %85, %cst_29 [0] : vector<16x128xf32> to vector<128xf32>
    %89 = vector.shape_cast %88 : vector<128xf32> to vector<1x128xf32>
    %cst_30 = arith.constant 1.600000e+01 : f32
    %90 = vector.broadcast %cst_30 : f32 to vector<1x128xf32>
    %91 = arith.divf %89, %90 : vector<1x128xf32>
    %92 = vector.broadcast %91 : vector<1x128xf32> to vector<16x128xf32>
    %93 = arith.subf %85, %92 : vector<16x128xf32>
    %94 = arith.mulf %93, %93 : vector<16x128xf32>
    %cst_31 = arith.constant dense<0.000000e+00> : vector<128xf32>
    %95 = vector.multi_reduction <add>, %94, %cst_31 [0] : vector<16x128xf32> to vector<128xf32>
    %96 = vector.shape_cast %95 : vector<128xf32> to vector<1x128xf32>
    %cst_32 = arith.constant 1.600000e+01 : f32
    %97 = vector.broadcast %cst_32 : f32 to vector<1x128xf32>
    %98 = arith.divf %96, %97 : vector<1x128xf32>
    %cst_33 = arith.constant 9.99999974E-6 : f32
    %99 = vector.broadcast %cst_33 : f32 to vector<1x128xf32>
    %100 = arith.addf %98, %99 : vector<1x128xf32>
    %101 = math.rsqrt %100 : vector<1x128xf32>
    %102 = vector.broadcast %101 : vector<1x128xf32> to vector<16x128xf32>
    %103 = arith.mulf %93, %102 : vector<16x128xf32>
    %104 = vector.broadcast %86 : vector<16x1xf32> to vector<16x128xf32>
    %105 = arith.mulf %103, %104 : vector<16x128xf32>
    %106 = vector.broadcast %87 : vector<16x1xf32> to vector<16x128xf32>
    %107 = arith.addf %105, %106 : vector<16x128xf32>
    %cst_34 = arith.constant 0.000000e+00 : f32
    %108 = vector.broadcast %cst_34 : f32 to vector<16x128xf32>
    %109 = arith.maximumf %107, %108 : vector<16x128xf32>
    %c32_35 = arith.constant 32 : index
    %c0_36 = arith.constant 0 : index
    %110 = vector.load %arg2[%c32_35, %c0_36] : memref<40x16xf32, #tpu.memory_space<vmem>>, vector<8x16xf32>
    %111 = vector.extract_strided_slice %0 {offsets = [0, 10], sizes = [8, 1], strides = [1, 1]} : vector<32x11xf32> to vector<8x1xf32>
    %cst_37 = arith.constant dense<0.000000e+00> : vector<8x128xf32>
    %112 = tpu.matmul %110, %109, %cst_37 {dimension_numbers = #tpu.dot_dimension_numbers<[1], [0], [0], [1], [0, 0, 1, 1], [], []>} : vector<8x16xf32>, vector<16x128xf32>, vector<8x128xf32> -> vector<8x128xf32>
    %113 = vector.broadcast %111 : vector<8x1xf32> to vector<8x128xf32>
    %114 = arith.addf %112, %113 : vector<8x128xf32>
    %115 = math.tanh %114 : vector<8x128xf32>
    %c0_38 = arith.constant 0 : index
    %c0_39 = arith.constant 0 : index
    %116 = vector.load %arg5[%c0_38, %c0_39] : memref<8x128xf32, #tpu.memory_space<vmem>>, vector<8x128xf32>
    tpu.vector_store %arg5[%c0_38, %c0_39], %115 {strides = array<i32>} : memref<8x128xf32, #tpu.memory_space<vmem>>, vector<8x128xf32>,
    return
  }
  func.func @transform_0(%arg0: i32) -> (i32, i32) {
    %c0_i32 = arith.constant 0 : i32
    %c0_i32_0 = arith.constant 0 : i32
    return %c0_i32, %arg0 : i32, i32
  }
  func.func @transform_1(%arg0: i32) -> (i32, i32) {
    %c0_i32 = arith.constant 0 : i32
    %c0_i32_0 = arith.constant 0 : i32
    %c0_i32_1 = arith.constant 0 : i32
    return %c0_i32, %c0_i32_0 : i32, i32
  }
  func.func @transform_2(%arg0: i32) -> (i32, i32) {
    %c0_i32 = arith.constant 0 : i32
    %c0_i32_0 = arith.constant 0 : i32
    %c0_i32_1 = arith.constant 0 : i32
    return %c0_i32, %c0_i32_0 : i32, i32
  }
  func.func @transform_3(%arg0: i32) -> (i32, i32) {
    %c0_i32 = arith.constant 0 : i32
    %c0_i32_0 = arith.constant 0 : i32
    %c0_i32_1 = arith.constant 0 : i32
    return %c0_i32, %c0_i32_0 : i32, i32
  }
  func.func @transform_4(%arg0: i32) -> (i32, i32) {
    %c0_i32 = arith.constant 0 : i32
    %c0_i32_0 = arith.constant 0 : i32
    return %c0_i32, %arg0 : i32, i32
  }
}

</mosaic_0001>

<bundles_post_ra>
// kernel: tpu_custom_call.1
= control target key start
LH: loop header
LB: loop body
LE: loop exit
PB: predicated region body
PF: predicated region fallthrough
CT: control target
= control target key end

     0   :  { %vm48_vm0 = vcmask 130048   ;;  %v677_v3 = vmov 0   ;;  %s848_s0 = inlined_call_operand.vmem [shape: f32[16,128], index: 0, kind: input, shape index: {}]   ;;  %s849_s1 = inlined_call_operand.vmem [shape: f32[40,16], index: 1, kind: input, shape index: {}]   ;;  %s850_s2 = inlined_call_operand.vmem [shape: f32[80,32], index: 2, kind: input, shape index: {}]   ;;  %s851_s3 = inlined_call_operand.vmem [shape: f32[32,11], index: 3, kind: input, shape index: {}]   ;;  %s852_s4 = inlined_call_operand.hbm [shape: f32[8,128], index: 4, kind: output, shape index: {}]  }
   0x1   :  { %v23_v0 = vld [vmem:[%s848_s0 + $0x8] sm:$0xff]  ;;  %v22_v1 = vld [vmem:[%s848_s0] sm:$0xff]  ;;  %613 = vset.pattern.permute.xlu0 %v677_v3  ;;  %614 = vset.pattern.permute.xlu1 %v677_v3  ;;  %v734_v5 = vld [vmem:[%s851_s3 + $0x10] sm:$0xff] }
   0x2   :  { %75 = vmatpush.msra.mxu0 %v23_v0  ;;  %v24_v2 = vld [vmem:[%s849_s1] sm:$0xff]  ;;  %40 = vperm.xlu1 %614, %v734_v5  }
   0x3   :  { %v728_v4 = vld [vmem:[%s851_s3] sm:$0xff] }
   0x4   :  { %30 = vperm.xlu0 %613, %v728_v4   ;;  %76 = vmatpush.msra.mxu0 %v22_v1 }
   0x5   :  { %9 = vsyncpa [#allocation3], 0  ;;  %584 = vmatmul.msk.f32.vlgmr.msra.gmra.mxu0 %vm48_vm0, %v24_v2  ;;  %v741_v6 = vld [vmem:[%s851_s3 + $0x18] sm:$0xff]  ;;  %v678_v7 = vmov 1   ;;  %v747_v8 = vld [vmem:[%s851_s3 + $0x8] sm:$0xff]  ;;  %v679_v11 = vmov 2  }
   0x6   :  { %615 = vset.pattern.permute.xlu2 %v678_v7  ;;  %v25_v9 = vld [vmem:[%s849_s1 + $0x8] sm:$0xff]  ;;  %v26_v10 = vld [vmem:[%s849_s1 + $0x10] sm:$0xff]  ;;  %v27_v12 = vld [vmem:[%s849_s1 + $0x18] sm:$0xff]  ;;  %v680_v16 = vmov 32.0   ;;  %v681_v2 = vmov 3   ;;  %vm204_vm5 = vcmask 261120  }
   0x7   :  { %153 = vperm.xlu2 %615, %v741_v6   ;;  %637 = vrcp.f32 %v680_v16  ;;  %s690_s27 = smov [#allocation2]   ;;  %s575_s5 = sshll.u32 %s852_s4, 4  ;;  %s576_s5 = int_to_ptr.hbm [resolvable:$true] %s575_s5 }
   0x8   :  { %s573_s28 = sshll.u32 %s690_s27, 4  ;;  %s574_s28 = int_to_ptr.vmem [resolvable:$true] %s573_s28 }
   0xa   :  { %45 = vperm.xlu1 %614, %v741_v6  }
   0xc   :  { %35 = vperm.xlu0 %613, %v747_v8  }
   0xd   :  { %585 = vmatmul.msk.f32.gmra.mxu0 %vm48_vm0, %v25_v9  ;;  %v638_v20 = vpop.eup %637 }
   0xe   :  { %v100_v24 = vmul.f32 32.0, %v638_v20  ;;  %vm104_vm1 = vweird.f32 %v638_v20 }
   0xf   :  { %149 = vperm.xlu2 %615, %v734_v5  }
  0x10   :  { %v101_v30 = vsub.f32 1.0, %v100_v24 }
  0x12   :  { %617 = vset.pattern.permute.xlu1 %v678_v7  ;;  %v102_v33 = vmul.f32 %v638_v20, %v101_v30 }
  0x13   :  { %145 = vperm.xlu1 %617, %v747_v8  }
  0x14   :  { %616 = vset.pattern.permute.xlu0 %v679_v11  ;;  %v103_v36 = vadd.f32 %v638_v20, %v102_v33  ;;  %v683_v33 = vmov 5  }
  0x15   :  { %173 = vperm.xlu0 %616, %v741_v6   ;;  %586 = vmatmul.msk.f32.gmra.mxu0 %vm48_vm0, %v26_v10 }
  0x16   :  { %v770_v39 = vsel %vm104_vm1, %v638_v20, %v103_v36  ;;  %v185_v36 = vld [vmem:[%s850_s2 + $0x8] sm:$0xff] }
  0x17   :  { %618 = vset.pattern.permute.xlu2 %v679_v11 }
  0x18   :  { %169 = vperm.xlu2 %618, %v734_v5  }
  0x1b   :  { %141 = vperm.xlu1 %617, %v728_v4  }
  0x1d   :  { %161 = vperm.xlu0 %616, %v728_v4   ;;  %587 = vmatmul.msk.f32.gmra.mxu0 %vm48_vm0, %v27_v12 }
  0x20   :  { %165 = vperm.xlu2 %618, %v747_v8  }
  0x23   :  { %619 = vset.pattern.permute.xlu1 %v681_v2 }
  0x24   :  { %189 = vperm.xlu1 %619, %v728_v4  }
  0x25   :  { %621 = vset.pattern.permute.xlu0 %v681_v2 }
  0x26   :  { %197 = vperm.xlu0 %621, %v734_v5  }
  0x28   :  { %620 = vset.pattern.permute.xlu2 %v681_v2 }
  0x29   :  { %193 = vperm.xlu2 %620, %v747_v8  }
  0x2c   :  { %201 = vperm.xlu1 %619, %v741_v6  }
  0x2e   :  { %624 = vset.pattern.permute.xlu0 %v683_v33 }
  0x2f   :  { %310 = vperm.xlu0 %624, %v728_v4  }
  0x61   :  { %v154_v58 = vpop.permute.xlu2 %153 }
  0x69   :  { %v150_v62 = vpop.permute.xlu2 %149 }
  0x72   :  { %v170_v10 = vpop.permute.xlu2 %169 }
  0x74   :  { %v41_v17 = vpop.permute.xlu1 %40 }
  0x76   :  { %v31_v14 = vpop.permute.xlu0 %30 }
  0x7c   :  { %v46_v26 = vpop.permute.xlu1 %45 }
  0x7e   :  { %v36_v18 = vpop.permute.xlu0 %35 }
  0x82   :  { %v78_v13 = vpop.f32.mrf.mxu0 }
  0x83   :  { %v79_v22 = vadd.f32 %v78_v13, %v31_v14 }
  0x85   :  { %v146_v7 = vpop.permute.xlu1 %145 }
  0x87   :  { %v174_v12 = vpop.permute.xlu0 %173 }
  0x8a   :  { %v81_v15 = vpop.f32.mrf.mxu0 }
  0x8b   :  { %v82_v21 = vadd.f32 %v81_v15, %v36_v18 }
  0x8d   :  { %v90_v25 = vadd.f32 %v82_v21, %v79_v22 }
  0x92   :  { %v84_v19 = vpop.f32.mrf.mxu0 }
  0x93   :  { %v85_v23 = vadd.f32 %v84_v19, %v41_v17 }
  0x95   :  { %v91_v28 = vadd.f32 %v90_v25, %v85_v23  ;;  %v166_v25 = vpop.permute.xlu2 %165 }
  0x9a   :  { %v87_v27 = vpop.f32.mrf.mxu0 }
  0x9b   :  { %v88_v29 = vadd.f32 %v87_v27, %v46_v26 }
  0x9d   :  { %v92_v31 = vadd.f32 %v91_v28, %v88_v29  ;;  %v162_v28 = vpop.permute.xlu0 %161 }
  0x9f   :  { %v93_v32 = vrot.slane %v92_v31, 4 }
  0xa1   :  { %v94_v34 = vadd.f32 %v93_v32, %v92_v31  ;;  %v682_v31 = vmov 4  }
  0xa2   :  { %622 = vset.pattern.permute.xlu2 %v682_v31  ;;  %623 = vset.pattern.permute.xlu1 %v682_v31 }
  0xa3   :  { %v95_v35 = vrot.slane %v94_v34, 2  ;;  %290 = vperm.xlu2 %622, %v728_v4   ;;  %294 = vperm.xlu1 %623, %v747_v8  }
  0xa5   :  { %v96_v37 = vadd.f32 %v95_v35, %v94_v34  ;;  %v184_v35 = vld [vmem:[%s850_s2] sm:$0xff] }
  0xa7   :  { %v97_v38 = vrot.slane %v96_v37, 1 }
  0xa9   :  { %v98_v40 = vadd.f32 %v97_v38, %v96_v37  ;;  %v186_v37 = vld [vmem:[%s850_s2 + $0x10] sm:$0xff]  ;;  %v187_v38 = vld [vmem:[%s850_s2 + $0x18] sm:$0xff] }
  0xab   :  { %v106_v41 = vmul.f32 %v770_v39, %v98_v40  ;;  %298 = vperm.xlu2 %622, %v734_v5   ;;  %625 = vset.pattern.permute.xlu1 %v683_v33 }
  0xac   :  { %314 = vperm.xlu1 %625, %v747_v8  }
  0xad   :  { %v107_v42 = vsub.f32 %v79_v22, %v106_v41  ;;  %v108_v43 = vsub.f32 %v82_v21, %v106_v41  ;;  %v109_v44 = vsub.f32 %v85_v23, %v106_v41  ;;  %v110_v45 = vsub.f32 %v88_v29, %v106_v41  ;;  %v142_v21 = vpop.permute.xlu1 %141 }
  0xaf   :  { %v111_v46 = vmul.f32 %v107_v42, %v107_v42  ;;  %v112_v47 = vmul.f32 %v108_v43, %v108_v43  ;;  %v113_v48 = vmul.f32 %v109_v44, %v109_v44  ;;  %v114_v50 = vmul.f32 %v110_v45, %v110_v45 }
  0xb1   :  { %v115_v49 = vadd.f32 %v112_v47, %v111_v46 }
  0xb3   :  { %v116_v51 = vadd.f32 %v115_v49, %v113_v48  ;;  %302 = vperm.xlu2 %622, %v741_v6  }
  0xb4   :  { %318 = vperm.xlu1 %625, %v734_v5  }
  0xb5   :  { %v117_v52 = vadd.f32 %v116_v51, %v114_v50 }
  0xb7   :  { %v118_v53 = vrot.slane %v117_v52, 4 }
  0xb9   :  { %v119_v54 = vadd.f32 %v118_v53, %v117_v52 }
  0xbb   :  { %v120_v55 = vrot.slane %v119_v54, 2  ;;  %626 = vset.pattern.permute.xlu2 %v683_v33 }
  0xbc   :  { %322 = vperm.xlu2 %626, %v741_v6  }
  0xbd   :  { %v121_v56 = vadd.f32 %v120_v55, %v119_v54 }
  0xbf   :  { %v122_v57 = vrot.slane %v121_v56, 1 }
  0xc1   :  { %v123_v59 = vadd.f32 %v122_v57, %v121_v56 }
  0xc3   :  { %v124_v60 = vmul.f32 %v123_v59, %v770_v39 }
  0xc5   :  { %v125_v61 = vadd.f32 1e-05, %v124_v60 }
  0xc7   :  { %639 = vrsqrt.f32 %v125_v61  ;;  %vm132_vm3 = vweird.f32 %v125_v61 }
  0xcd   :  { %v640_v63 = vpop.eup %639 }
  0xce   :  { %v127_v0 = vmul.f32 %v640_v63, %v125_v61  ;;  %vm133_vm2 = vweird.f32 %v640_v63 }
  0xcf   :  { %vm134_vm4 = vmor %vm132_vm3, %vm133_vm2 }
  0xd0   :  { %v128_v1 = vmul.f32 %v640_v63, %v127_v0 }
  0xd2   :  { %v129_v3 = vmul.f32 0.5, %v128_v1 }
  0xd4   :  { %v130_v9 = vsub.f32 1.5, %v129_v3 }
  0xd6   :  { %v131_v11 = vmul.f32 %v640_v63, %v130_v9 }
  0xd8   :  { %v135_v13 = vsel %vm134_vm4, %v640_v63, %v131_v11 }
  0xd9   :  { %v139_v14 = vmul.f32 %v135_v13, %v110_v45  ;;  %v138_v15 = vmul.f32 %v135_v13, %v109_v44  ;;  %v137_v16 = vmul.f32 %v135_v13, %v108_v43  ;;  %v136_v17 = vmul.f32 %v135_v13, %v107_v42  ;;  %v190_v42 = vpop.permute.xlu1 %189  ;;  %v194_v43 = vpop.permute.xlu2 %193 }
  0xda   :  { %v198_v45 = vpop.permute.xlu0 %197 }
  0xdb   :  { %v159_v18 = vmul.f32 %v154_v58, %v139_v14  ;;  %v158_v19 = vmul.f32 %v150_v62, %v138_v15  ;;  %v157_v20 = vmul.f32 %v146_v7, %v137_v16  ;;  %v156_v23 = vmul.f32 %v142_v21, %v136_v17 }
  0xdd   :  { %v178_v22 = vadd.f32 %v170_v10, %v158_v19  ;;  %v179_v24 = vadd.f32 %v174_v12, %v159_v18  ;;  %v177_v26 = vadd.f32 %v166_v25, %v157_v20  ;;  %v176_v30 = vadd.f32 %v162_v28, %v156_v23 }
  0xdf   :  { %v183_v27 = vmax.f32 %v179_v24, 0.0  ;;  %v182_v29 = vmax.f32 %v178_v22, 0.0  ;;  %v181_v32 = vmax.f32 %v177_v26, 0.0  ;;  %v180_v34 = vmax.f32 %v176_v30, 0.0 }
  0xe1   :  { %229 = vmatpush.msra.mxu1 %v183_v27  ;;  %v202_v50 = vpop.permute.xlu1 %201 }
  0xe3   :  { %230 = vmatpush.msra.mxu1 %v182_v29 }
  0xe5   :  { %231 = vmatpush.msra.mxu1 %v181_v32 }
  0xe7   :  { %232 = vmatpush.msra.mxu1 %v180_v34 }
  0xe8   :  { %588 = vmatmul.msk.f32.vlgmr.msra.gmra.mxu1 %vm204_vm5, %v184_v35 }
  0xf0   :  { %589 = vmatmul.msk.f32.gmra.mxu1 %vm204_vm5, %v185_v36 }
  0xf8   :  { %590 = vmatmul.msk.f32.gmra.mxu1 %vm204_vm5, %v186_v37  ;;  %v311_v37 = vpop.permute.xlu0 %310 }
  0xfd   :  { %v291_v18 = vpop.permute.xlu2 %290 }
 0x100   :  { %591 = vmatmul.msk.f32.gmra.mxu1 %vm204_vm5, %v187_v38 }
 0x105   :  { %v299_v23 = vpop.permute.xlu2 %298 }
 0x10d   :  { %v303_v30 = vpop.permute.xlu2 %302 }
 0x115   :  { %v295_v22 = vpop.permute.xlu1 %294 }
 0x11e   :  { %v315_v28 = vpop.permute.xlu1 %314 }
 0x165   :  { %v234_v40 = vpop.f32.mrf.mxu1 }
 0x166   :  { %v235_v47 = vadd.f32 %v234_v40, %v190_v42 }
 0x16d   :  { %v237_v41 = vpop.f32.mrf.mxu1 }
 0x16e   :  { %v238_v46 = vadd.f32 %v237_v41, %v194_v43  ;;  %v319_v43 = vpop.permute.xlu1 %318 }
 0x170   :  { %v246_v49 = vadd.f32 %v238_v46, %v235_v47 }
 0x175   :  { %v240_v44 = vpop.f32.mrf.mxu1 }
 0x176   :  { %v241_v48 = vadd.f32 %v240_v44, %v198_v45  ;;  %v323_v44 = vpop.permute.xlu2 %322 }
 0x178   :  { %v247_v52 = vadd.f32 %v246_v49, %v241_v48 }
 0x17d   :  { %v243_v51 = vpop.f32.mrf.mxu1 }
 0x17e   :  { %v244_v53 = vadd.f32 %v243_v51, %v202_v50 }
 0x180   :  { %v248_v54 = vadd.f32 %v247_v52, %v244_v53 }
 0x182   :  { %v249_v55 = vrot.slane %v248_v54, 4 }
 0x184   :  { %v250_v56 = vadd.f32 %v249_v55, %v248_v54 }
 0x186   :  { %v251_v57 = vrot.slane %v250_v56, 2 }
 0x188   :  { %v252_v58 = vadd.f32 %v251_v57, %v250_v56 }
 0x18a   :  { %v253_v59 = vrot.slane %v252_v58, 1 }
 0x18c   :  { %v254_v60 = vadd.f32 %v253_v59, %v252_v58 }
 0x18e   :  { %v255_v61 = vmul.f32 %v254_v60, %v770_v39 }
 0x190   :  { %v257_v62 = vsub.f32 %v238_v46, %v255_v61  ;;  %v258_v63 = vsub.f32 %v241_v48, %v255_v61  ;;  %v256_v0 = vsub.f32 %v235_v47, %v255_v61  ;;  %v259_v1 = vsub.f32 %v244_v53, %v255_v61 }
 0x192   :  { %v260_v2 = vmul.f32 %v256_v0, %v256_v0  ;;  %v261_v3 = vmul.f32 %v257_v62, %v257_v62  ;;  %v262_v7 = vmul.f32 %v258_v63, %v258_v63  ;;  %v263_v10 = vmul.f32 %v259_v1, %v259_v1 }
 0x194   :  { %v264_v9 = vadd.f32 %v261_v3, %v260_v2 }
 0x196   :  { %v265_v11 = vadd.f32 %v264_v9, %v262_v7 }
 0x198   :  { %v266_v12 = vadd.f32 %v265_v11, %v263_v10 }
 0x19a   :  { %v267_v13 = vrot.slane %v266_v12, 4 }
 0x19c   :  { %v268_v14 = vadd.f32 %v267_v13, %v266_v12 }
 0x19e   :  { %v269_v15 = vrot.slane %v268_v14, 2 }
 0x1a0   :  { %v270_v16 = vadd.f32 %v269_v15, %v268_v14 }
 0x1a2   :  { %v271_v17 = vrot.slane %v270_v16, 1 }
 0x1a4   :  { %v272_v19 = vadd.f32 %v271_v17, %v270_v16 }
 0x1a6   :  { %v273_v20 = vmul.f32 %v272_v19, %v770_v39 }
 0x1a8   :  { %v274_v21 = vadd.f32 1e-05, %v273_v20 }
 0x1aa   :  { %641 = vrsqrt.f32 %v274_v21  ;;  %vm281_vm7 = vweird.f32 %v274_v21 }
 0x1b0   :  { %v642_v24 = vpop.eup %641 }
 0x1b1   :  { %v276_v25 = vmul.f32 %v642_v24, %v274_v21  ;;  %vm282_vm6 = vweird.f32 %v642_v24  ;;  %v684_v21 = vmov 6  }
 0x1b2   :  { %vm283_vm8 = vmor %vm281_vm7, %vm282_vm6  ;;  %628 = vset.pattern.permute.xlu1 %v684_v21  ;;  %627 = vset.pattern.permute.xlu0 %v684_v21 }
 0x1b3   :  { %v277_v26 = vmul.f32 %v642_v24, %v276_v25  ;;  %389 = vperm.xlu1 %628, %v734_v5   ;;  %393 = vperm.xlu0 %627, %v741_v6  }
 0x1b4   :  { %629 = vset.pattern.permute.xlu2 %v684_v21 }
 0x1b5   :  { %v278_v27 = vmul.f32 0.5, %v277_v26  ;;  %385 = vperm.xlu2 %629, %v747_v8  }
 0x1b7   :  { %v279_v29 = vsub.f32 1.5, %v278_v27 }
 0x1b9   :  { %v280_v31 = vmul.f32 %v642_v24, %v279_v29 }
 0x1bb   :  { %v284_v32 = vsel %vm283_vm8, %v642_v24, %v280_v31  ;;  %381 = vperm.xlu1 %628, %v728_v4   ;;  %v333_v31 = vld [vmem:[%s850_s2 + $0x20] sm:$0xff] }
 0x1bc   :  { %v285_v33 = vmul.f32 %v284_v32, %v256_v0  ;;  %v287_v34 = vmul.f32 %v284_v32, %v258_v63  ;;  %v286_v35 = vmul.f32 %v284_v32, %v257_v62  ;;  %v288_v36 = vmul.f32 %v284_v32, %v259_v1  ;;  %v334_v32 = vld [vmem:[%s850_s2 + $0x28] sm:$0xff] }
 0x1be   :  { %v305_v38 = vmul.f32 %v291_v18, %v285_v33  ;;  %v307_v40 = vmul.f32 %v299_v23, %v287_v34  ;;  %v306_v41 = vmul.f32 %v295_v22, %v286_v35  ;;  %v308_v42 = vmul.f32 %v303_v30, %v288_v36  ;;  %v335_v33 = vld [vmem:[%s850_s2 + $0x30] sm:$0xff]  ;;  %v336_v34 = vld [vmem:[%s850_s2 + $0x38] sm:$0xff] }
 0x1c0   :  { %v326_v45 = vadd.f32 %v315_v28, %v306_v41  ;;  %v327_v46 = vadd.f32 %v319_v43, %v307_v40  ;;  %v325_v47 = vadd.f32 %v311_v37, %v305_v38  ;;  %v328_v49 = vadd.f32 %v323_v44, %v308_v42 }
 0x1c1   :  { %v685_v37 = vmov 7   ;;  %v686_v38 = vmov 8   ;;  %v687_v43 = vmov 9  }
 0x1c2   :  { %v330_v48 = vmax.f32 %v326_v45, 0.0  ;;  %v329_v50 = vmax.f32 %v325_v47, 0.0  ;;  %v331_v51 = vmax.f32 %v327_v46, 0.0  ;;  %v332_v53 = vmax.f32 %v328_v49, 0.0  ;;  %631 = vset.pattern.permute.xlu0 %v685_v37  ;;  %630 = vset.pattern.permute.xlu2 %v685_v37 }
 0x1c3   :  { %444 = vperm.xlu0 %631, %v747_v8   ;;  %440 = vperm.xlu2 %630, %v728_v4  }
 0x1c4   :  { %v337_v52 = vadd.f32 %v330_v48, %v329_v50  ;;  %632 = vset.pattern.permute.xlu1 %v686_v38 }
 0x1c5   :  { %521 = vperm.xlu1 %632, %v747_v8  }
 0x1c6   :  { %v338_v54 = vadd.f32 %v337_v52, %v331_v51  ;;  %v688_v52 = vmov 16.0  }
 0x1c8   :  { %v339_v55 = vadd.f32 %v338_v54, %v332_v53 }
 0x1ca   :  { %v340_v56 = vrot.slane %v339_v55, 4 }
 0x1cb   :  { %633 = vset.pattern.permute.xlu2 %v686_v38 }
 0x1cc   :  { %v341_v57 = vadd.f32 %v340_v56, %v339_v55  ;;  %517 = vperm.xlu2 %633, %v728_v4  }
 0x1cd   :  { %634 = vset.pattern.permute.xlu1 %v687_v43 }
 0x1ce   :  { %v342_v58 = vrot.slane %v341_v57, 2  ;;  %531 = vperm.xlu1 %634, %v747_v8   ;;  %v438_v8 = vld [vmem:[%s850_s2 + $0x48] sm:$0xff] }
 0x1d0   :  { %v343_v59 = vadd.f32 %v342_v58, %v341_v57 }
 0x1d2   :  { %v344_v60 = vrot.slane %v343_v59, 1 }
 0x1d4   :  { %v345_v61 = vadd.f32 %v344_v60, %v343_v59  ;;  %635 = vset.pattern.permute.xlu2 %v687_v43  ;;  %v538_v43 = vld [vmem:[%s849_s1 + $0x20] sm:$0xff] }
 0x1d5   :  { %527 = vperm.xlu2 %635, %v728_v4  }
 0x1d6   :  { %v346_v62 = vmul.f32 %v345_v61, %v770_v39 }
 0x1d8   :  { %v347_v63 = vsub.f32 %v329_v50, %v346_v62  ;;  %v348_v0 = vsub.f32 %v330_v48, %v346_v62  ;;  %v349_v1 = vsub.f32 %v331_v51, %v346_v62  ;;  %v350_v7 = vsub.f32 %v332_v53, %v346_v62  ;;  %v437_v51 = vld [vmem:[%s850_s2 + $0x40] sm:$0xff] }
 0x1da   :  { %v351_v2 = vmul.f32 %v347_v63, %v347_v63  ;;  %v352_v3 = vmul.f32 %v348_v0, %v348_v0  ;;  %v353_v10 = vmul.f32 %v349_v1, %v349_v1  ;;  %v354_v11 = vmul.f32 %v350_v7, %v350_v7 }
 0x1dc   :  { %v355_v9 = vadd.f32 %v352_v3, %v351_v2 }
 0x1de   :  { %v356_v12 = vadd.f32 %v355_v9, %v353_v10 }
 0x1e0   :  { %v357_v13 = vadd.f32 %v356_v12, %v354_v11 }
 0x1e2   :  { %v358_v14 = vrot.slane %v357_v13, 4 }
 0x1e4   :  { %v359_v15 = vadd.f32 %v358_v14, %v357_v13 }
 0x1e6   :  { %v360_v16 = vrot.slane %v359_v15, 2 }
 0x1e8   :  { %v361_v17 = vadd.f32 %v360_v16, %v359_v15 }
 0x1ea   :  { %v362_v18 = vrot.slane %v361_v17, 1 }
 0x1ec   :  { %v363_v19 = vadd.f32 %v362_v18, %v361_v17 }
 0x1ee   :  { %v364_v20 = vmul.f32 %v363_v19, %v770_v39 }
 0x1f0   :  { %v365_v22 = vadd.f32 1e-05, %v364_v20 }
 0x1f2   :  { %643 = vrsqrt.f32 %v365_v22  ;;  %vm372_vm10 = vweird.f32 %v365_v22 }
 0x1f3   :  { %645 = vrcp.f32 %v688_v52 }
 0x1f8   :  { %v644_v23 = vpop.eup %643 }
 0x1f9   :  { %v367_v24 = vmul.f32 %v644_v23, %v365_v22  ;;  %vm373_vm9 = vweird.f32 %v644_v23  ;;  %v646_v54 = vpop.eup %645 }
 0x1fa   :  { %vm374_vm11 = vmor %vm372_vm10, %vm373_vm9  ;;  %v484_v56 = vmul.f32 16.0, %v646_v54  ;;  %vm488_vm12 = vweird.f32 %v646_v54 }
 0x1fb   :  { %v368_v25 = vmul.f32 %v644_v23, %v367_v24 }
 0x1fc   :  { %v485_v61 = vsub.f32 1.0, %v484_v56 }
 0x1fd   :  { %v369_v26 = vmul.f32 0.5, %v368_v25 }
 0x1ff   :  { %v370_v27 = vsub.f32 1.5, %v369_v26  ;;  %v689_v26 = vmov 10  }
 0x200   :  { %636 = vset.pattern.permute.xlu0 %v689_v26 }
 0x201   :  { %v371_v39 = vmul.f32 %v644_v23, %v370_v27  ;;  %540 = vperm.xlu0 %636, %v728_v4  }
 0x203   :  { %v375_v28 = vsel %vm374_vm11, %v644_v23, %v371_v39 }
 0x204   :  { %v379_v5 = vmul.f32 %v375_v28, %v350_v7  ;;  %v378_v6 = vmul.f32 %v375_v28, %v349_v1  ;;  %v377_v29 = vmul.f32 %v375_v28, %v348_v0  ;;  %v376_v30 = vmul.f32 %v375_v28, %v347_v63 }
 0x205   :  { %v486_v0 = vmul.f32 %v646_v54, %v485_v61 }
 0x206   :  { %420 = vmatpush.msra.mxu2 %v379_v5 }
 0x207   :  { %v487_v3 = vadd.f32 %v646_v54, %v486_v0 }
 0x208   :  { %421 = vmatpush.msra.mxu2 %v378_v6 }
 0x209   :  { %v489_v10 = vsel %vm488_vm12, %v646_v54, %v487_v3 }
 0x20a   :  { %422 = vmatpush.msra.mxu2 %v377_v29 }
 0x20c   :  { %423 = vmatpush.msra.mxu2 %v376_v30 }
 0x20d   :  { %592 = vmatmul.msk.f32.vlgmr.msra.gmra.mxu2 %vm204_vm5, %v333_v31 }
 0x20f   :  { %v386_v46 = vpop.permute.xlu2 %385 }
 0x215   :  { %593 = vmatmul.msk.f32.gmra.mxu2 %vm204_vm5, %v334_v32 }
 0x21d   :  { %594 = vmatmul.msk.f32.gmra.mxu2 %vm204_vm5, %v335_v33  ;;  %v441_v55 = vpop.permute.xlu2 %440 }
 0x225   :  { %595 = vmatmul.msk.f32.gmra.mxu2 %vm204_vm5, %v336_v34  ;;  %v390_v41 = vpop.permute.xlu1 %389  ;;  %v394_v42 = vpop.permute.xlu0 %393 }
 0x226   :  { %v518_v6 = vpop.permute.xlu2 %517 }
 0x22d   :  { %v382_v48 = vpop.permute.xlu1 %381 }
 0x235   :  { %v445_v57 = vpop.permute.xlu0 %444 }
 0x237   :  { %v522_v28 = vpop.permute.xlu1 %521 }
 0x290   :  { %v425_v35 = vpop.f32.mrf.mxu2 }
 0x291   :  { %v426_v50 = vadd.f32 %v425_v35, %v382_v48  ;;  %v528_v35 = vpop.permute.xlu2 %527 }
 0x298   :  { %v428_v36 = vpop.f32.mrf.mxu2 }
 0x299   :  { %v429_v49 = vadd.f32 %v428_v36, %v386_v46  ;;  %v532_v36 = vpop.permute.xlu1 %531 }
 0x2a0   :  { %v431_v40 = vpop.f32.mrf.mxu2 }
 0x2a1   :  { %v432_v47 = vadd.f32 %v431_v40, %v390_v41 }
 0x2a8   :  { %v434_v44 = vpop.f32.mrf.mxu2 }
 0x2a9   :  { %v435_v45 = vadd.f32 %v434_v44, %v394_v42  ;;  %v541_v44 = vpop.permute.xlu0 %540 }
 0x2ab   :  { %465 = vmatpush.msra.mxu3 %v435_v45 }
 0x2ad   :  { %466 = vmatpush.msra.mxu3 %v432_v47 }
 0x2af   :  { %467 = vmatpush.msra.mxu3 %v429_v49 }
 0x2b1   :  { %468 = vmatpush.msra.mxu3 %v426_v50 }
 0x2b2   :  { %596 = vmatmul.msk.f32.vlgmr.msra.gmra.mxu3 %vm204_vm5, %v437_v51 }
 0x2ba   :  { %597 = vmatmul.msk.f32.gmra.mxu3 %vm204_vm5, %v438_v8 }
 0x335   :  { %v470_v53 = vpop.f32.mrf.mxu3 }
 0x336   :  { %v471_v59 = vadd.f32 %v470_v53, %v441_v55 }
 0x33d   :  { %v473_v58 = vpop.f32.mrf.mxu3 }
 0x33e   :  { %v474_v60 = vadd.f32 %v473_v58, %v445_v57 }
 0x340   :  { %v476_v62 = vadd.f32 %v474_v60, %v471_v59 }
 0x342   :  { %v477_v63 = vrot.slane %v476_v62, 4 }
 0x344   :  { %v478_v1 = vadd.f32 %v477_v63, %v476_v62 }
 0x346   :  { %v479_v2 = vrot.slane %v478_v1, 2 }
 0x348   :  { %v480_v7 = vadd.f32 %v479_v2, %v478_v1 }
 0x34a   :  { %v481_v9 = vrot.slane %v480_v7, 1 }
 0x34c   :  { %v482_v11 = vadd.f32 %v481_v9, %v480_v7 }
 0x34e   :  { %v490_v12 = vmul.f32 %v489_v10, %v482_v11 }
 0x350   :  { %v491_v13 = vsub.f32 %v471_v59, %v490_v12  ;;  %v492_v14 = vsub.f32 %v474_v60, %v490_v12 }
 0x352   :  { %v493_v15 = vmul.f32 %v491_v13, %v491_v13  ;;  %v494_v16 = vmul.f32 %v492_v14, %v492_v14 }
 0x354   :  { %v495_v17 = vadd.f32 %v494_v16, %v493_v15 }
 0x356   :  { %v496_v18 = vrot.slane %v495_v17, 4 }
 0x358   :  { %v497_v19 = vadd.f32 %v496_v18, %v495_v17 }
 0x35a   :  { %v498_v20 = vrot.slane %v497_v19, 2 }
 0x35c   :  { %v499_v21 = vadd.f32 %v498_v20, %v497_v19 }
 0x35e   :  { %v500_v22 = vrot.slane %v499_v21, 1 }
 0x360   :  { %v501_v23 = vadd.f32 %v500_v22, %v499_v21 }
 0x362   :  { %v502_v24 = vmul.f32 %v501_v23, %v489_v10 }
 0x364   :  { %v503_v25 = vadd.f32 1e-05, %v502_v24 }
 0x366   :  { %647 = vrsqrt.f32 %v503_v25  ;;  %vm510_vm14 = vweird.f32 %v503_v25 }
 0x36c   :  { %v648_v27 = vpop.eup %647 }
 0x36d   :  { %v505_v39 = vmul.f32 %v648_v27, %v503_v25  ;;  %vm511_vm13 = vweird.f32 %v648_v27 }
 0x36e   :  { %vm512_vm15 = vmor %vm510_vm14, %vm511_vm13 }
 0x36f   :  { %v506_v5 = vmul.f32 %v648_v27, %v505_v39 }
 0x371   :  { %v507_v29 = vmul.f32 0.5, %v506_v5 }
 0x373   :  { %v508_v30 = vsub.f32 1.5, %v507_v29 }
 0x375   :  { %v509_v31 = vmul.f32 %v648_v27, %v508_v30 }
 0x377   :  { %v513_v32 = vsel %vm512_vm15, %v648_v27, %v509_v31 }
 0x378   :  { %v515_v33 = vmul.f32 %v513_v32, %v492_v14  ;;  %v514_v34 = vmul.f32 %v513_v32, %v491_v13 }
 0x37a   :  { %v525_v37 = vmul.f32 %v522_v28, %v515_v33  ;;  %v524_v38 = vmul.f32 %v518_v6, %v514_v34 }
 0x37c   :  { %v534_v4 = vadd.f32 %v528_v35, %v524_v38  ;;  %v535_v40 = vadd.f32 %v532_v36, %v525_v37 }
 0x37e   :  { %v537_v41 = vmax.f32 %v535_v40, 0.0  ;;  %v536_v42 = vmax.f32 %v534_v4, 0.0 }
 0x380   :  { %560 = vmatpush.msrb.mxu3 %v537_v41 }
 0x382   :  { %561 = vmatpush.msrb.mxu3 %v536_v42 }
 0x383   :  { %598 = vmatmul.msk.f32.vlgmr.msrb.gmra.mxu3 %vm48_vm0, %v538_v43 }
 0x406   :  { %v563_v45 = vpop.f32.mrf.mxu3 }
 0x407   :  { %v564_v46 = vadd.f32 %v563_v45, %v541_v44 }
 0x409   :  { %649 = vtanh.f32 %v564_v46 }
 0x40f   :  { %v650_v47 = vpop.eup %649 }
 0x410   :  { %567 = vst [vmem:[#allocation2] sm:$0xff] %v650_v47 }
 0x411   :  { %578 = dma.vmem_to_hbm [thread:$0]  %s574_s28, 128, %s576_s5, [#allocation3]  }
 0x412   :  { %675 = dma.done.wait [#allocation3], 128  }
 0x413   :  { %676 = vsyncadd [#allocation3], 4294967168 }
 0x414   :  { %583 = vsyncpa [#allocation3], 1 }

</bundles_post_ra>
